<compile_context>
chip_gen: v5e
topology: v5e:2x2
jax: 0.10.0
libtpu: 0.0.40
codegen_flags: <defaults>
</compile_context>

<pallas_src>
import functools

import jax
import jax.numpy as jnp
import numpy as np
from jax import lax
from jax.experimental import pallas as pl
from jax.experimental.pallas import tpu as pltpu


def _round_up(n, m):
    return ((n + m - 1) // m) * m


def kws_kernel(x_ref, w_ref, u_ref, bz_ref, db_ref, zs_ref, ns_ref,
               wc_ref, bc_ref, out_ref, h_ref, pre_ref,
               *, t_total, needs_mask, unroll):
    """One (batch block, time chunk) grid step of the FastGRNN KWS forward.

    x_ref  : (Tc, Bt, D)   bf16 input chunk (feature dim NOT padded)
    w_ref  : (D, Hp)       bf16 input weights
    u_ref  : (Hp, Hp)      bf16 recurrent weights
    bz_ref : (1, Hp)       f32 z-gate bias
    db_ref : (1, Hp)       f32 (b_h - b_z)
    zs_ref : (1, Hp)       f32 sigmoid(zeta) (pre-broadcast row)
    ns_ref : (1, Hp)       f32 sigmoid(nu)   (pre-broadcast row)
    wc_ref : (Hp, Kp)      bf16 classifier weights
    bc_ref : (1, Kp)       f32 classifier bias (padded cols = -1e30)
    out_ref: (Bt, Kp)      f32 log-softmax keyword scores (written at last chunk)
    h_ref  : (Bt, Hp)      f32 hidden-state carry across time chunks (scratch)
    pre_ref: (Tc, Bt, Hp)  f32 hoisted x@W + b_z for this chunk (scratch)
    """
    tc = pl.program_id(1)
    n_tc = pl.num_programs(1)
    Tc, Bt, Hp = pre_ref.shape
    D = x_ref.shape[-1]

    @pl.when(tc == 0)
    def _():
        h_ref[...] = jnp.zeros_like(h_ref)

    # Hoisted input projection for this chunk: one big bf16 MXU matmul with the
    # z-gate bias folded in once -- off the serial recurrence critical path.
    x2d = x_ref[...].reshape(Tc * Bt, D)
    pre = jnp.dot(x2d, w_ref[...], preferred_element_type=jnp.float32)
    pre_ref[...] = (pre + bz_ref[...]).reshape(Tc, Bt, Hp)

    # Loop-invariant broadcasts hoisted out of the recurrence (JAX does not CSE
    # broadcast_in_dim, so doing these per step would re-emit them).
    zs = jnp.broadcast_to(zs_ref[...], (Bt, Hp))   # sigmoid(zeta)
    ns = jnp.broadcast_to(ns_ref[...], (Bt, Hp))   # sigmoid(nu)
    db = jnp.broadcast_to(db_ref[...], (Bt, Hp))   # b_h - b_z

    def step(t, h):
        # TODO(synk): pltpu.matmul_push_rhs(u) once before the loop +
        # matmul_acc_lhs/matmul_pop per step would keep U resident in MXU
        # weight registers; kept as jnp.dot until those semantics are validated.
        s = pre_ref[t] + jnp.dot(h.astype(u_ref.dtype), u_ref[...],
                                 preferred_element_type=jnp.float32)
        z = jax.nn.sigmoid(s)            # s already carries b_z
        h_cap = jnp.tanh(s + db)         # + (b_h - b_z)  ==  x@W + h@U + b_h
        h_new = (zs * (1.0 - z) + ns) * h_cap + z * h
        if needs_mask:                   # trace-time flag: padded tail steps
            h_new = jnp.where(tc * Tc + t < t_total, h_new, h)
        return h_new

    h = lax.fori_loop(0, Tc, step, h_ref[...], unroll=unroll)
    h_ref[...] = h

    @pl.when(tc == n_tc - 1)
    def _():
        # Classifier + numerically stable log_softmax.  Padded K columns carry
        # a -1e30 bias so they never affect the max / logsumexp.
        logits = jnp.dot(h.astype(wc_ref.dtype), wc_ref[...],
                         preferred_element_type=jnp.float32) + bc_ref[...]
        m = jnp.max(logits, axis=-1, keepdims=True)
        shifted = logits - m
        lse = jnp.log(jnp.sum(jnp.exp(shifted), axis=-1, keepdims=True))
        out_ref[...] = shifted - lse


def keyword_spotter_forward(x, params, *, time_chunk=64, batch_tile=32):
    """x: (T, B, D) float32, time-major. Returns (B, K) log-probabilities."""
    T, B, D = x.shape
    W, U, bz, bh, zeta, nu, Wc, bc = params
    H = U.shape[0]
    K = Wc.shape[1]

    f32, bf16 = jnp.float32, jnp.bfloat16

    # Tiling: batch tile <= 32 rows (vreg pressure / megacore split on v7x),
    # hidden/keyword dims padded to lane multiples, time padded to the chunk.
    Bt = min(_round_up(B, 8), _round_up(batch_tile, 8))
    Bp = _round_up(B, Bt)
    Hp = _round_up(H, 128)
    Kp = _round_up(K, 128)
    Tc = min(time_chunk, T)
    Tp = _round_up(T, Tc)
    nb, ntc = Bp // Bt, Tp // Tc

    # bf16 matmul operands (f32 accumulation in-kernel).  Feature dim D of x is
    # left unpadded -- it's the only HBM-dominant input.
    xp = jnp.zeros((Tp, Bp, D), bf16).at[:T, :B, :].set(x.astype(bf16))
    Wp = jnp.zeros((D, Hp), bf16).at[:, :H].set(W.astype(bf16))
    Up = jnp.zeros((Hp, Hp), bf16).at[:H, :H].set(U.astype(bf16))
    Wcp = jnp.zeros((Hp, Kp), bf16).at[:H, :K].set(Wc.astype(bf16))
    bzp = jnp.zeros((1, Hp), f32).at[:, :H].set(bz.reshape(1, H))
    dbp = jnp.zeros((1, Hp), f32).at[:, :H].set((bh - bz).reshape(1, H))
    bcp = jnp.full((1, Kp), -1e30, f32).at[:, :K].set(bc.reshape(1, K))
    # Gate-mixing scalars: sigmoid applied once, outside the recurrence.
    zs_row = jnp.full((1, Hp), jax.nn.sigmoid(zeta).reshape(()), dtype=f32)
    ns_row = jnp.full((1, Hp), jax.nn.sigmoid(nu).reshape(()), dtype=f32)

    kernel = functools.partial(
        kws_kernel, t_total=T, needs_mask=(Tp != T), unroll=min(Tc, 8))

    whole = lambda b, t: (0, 0)   # weights / bias rows: resident, never re-DMAd
    grid_spec = pltpu.PrefetchScalarGridSpec(
        num_scalar_prefetch=0,
        grid=(nb, ntc),
        in_specs=[
            pl.BlockSpec((Tc, Bt, D), lambda b, t: (t, b, 0)),  # x chunk
            pl.BlockSpec((D, Hp), whole),      # W
            pl.BlockSpec((Hp, Hp), whole),     # U
            pl.BlockSpec((1, Hp), whole),      # b_z
            pl.BlockSpec((1, Hp), whole),      # b_h - b_z
            pl.BlockSpec((1, Hp), whole),      # sigmoid(zeta)
            pl.BlockSpec((1, Hp), whole),      # sigmoid(nu)
            pl.BlockSpec((Hp, Kp), whole),     # Wc
            pl.BlockSpec((1, Kp), whole),      # bc
        ],
        out_specs=pl.BlockSpec((Bt, Kp), lambda b, t: (b, 0)),
        scratch_shapes=[
            pltpu.VMEM((Bt, Hp), f32),         # hidden-state carry across chunks
            pltpu.VMEM((Tc, Bt, Hp), f32),     # hoisted x@W (+ b_z) per chunk
        ],
    )

    # Explicit scoped-VMEM budget sized to the actual buffers (with headroom).
    vmem_est = (
        2 * Tc * Bt * D * 2                          # x chunk, double-buffered
        + 2 * (D * Hp + Hp * Hp + Hp * Kp) * 2       # bf16 weights
        + 2 * (4 * Hp + Kp) * 4                      # bias / gate rows
        + 2 * Bt * Kp * 4                            # output block
        + (Bt * Hp + Tc * Bt * Hp) * 4               # scratch
    )
    vmem_limit = int(min(64 << 20, max(32 << 20, 2 * vmem_est)))

    out_p = pl.pallas_call(
        kernel,
        out_shape=jax.ShapeDtypeStruct((Bp, Kp), f32),
        grid_spec=grid_spec,
        compiler_params=pltpu.CompilerParams(
            dimension_semantics=("parallel", "arbitrary"),
            vmem_limit_bytes=vmem_limit),
    )(xp, Wp, Up, bzp, dbp, zs_row, ns_row, Wcp, bcp)

    return out_p[:B, :K]


def keyword_spotter_reference(x, params, *, matmul_dtype=jnp.float32):
    """Pure-JAX reference; matmul_dtype lets it match the kernel's bf16 MXU."""
    W, U, bz, bh, zeta, nu, Wc, bc = params
    md = matmul_dtype
    z_s = jax.nn.sigmoid(zeta)
    n_s = jax.nn.sigmoid(nu)
    Wm, Um, Wcm = W.astype(md), U.astype(md), Wc.astype(md)

    def step(h, x_t):
        pre = (jnp.dot(x_t.astype(md), Wm, preferred_element_type=jnp.float32)
               + jnp.dot(h.astype(md), Um, preferred_element_type=jnp.float32))
        z = jax.nn.sigmoid(pre + bz)
        h_cap = jnp.tanh(pre + bh)
        return (z_s * (1.0 - z) + n_s) * h_cap + z * h, None

    h0 = jnp.zeros((x.shape[1], U.shape[0]), jnp.float32)
    h_final, _ = lax.scan(step, h0, x)
    logits = jnp.dot(h_final.astype(md), Wcm,
                     preferred_element_type=jnp.float32) + bc
    return jax.nn.log_softmax(logits, axis=-1)


def _make_params(key, D, H, K):
    keys = jax.random.split(key, 6)
    W = 0.1 * jax.random.normal(keys[0], (D, H), dtype=jnp.float32)
    U = 0.1 * jax.random.normal(keys[1], (H, H), dtype=jnp.float32)
    bz = 0.1 * jax.random.normal(keys[2], (1, H), dtype=jnp.float32)
    bh = 0.1 * jax.random.normal(keys[3], (1, H), dtype=jnp.float32)
    zeta = jnp.ones((1, 1), dtype=jnp.float32)        # raw; sigmoid in wrapper
    nu = -4.0 * jnp.ones((1, 1), dtype=jnp.float32)   # raw; sigmoid in wrapper
    Wc = 0.1 * jax.random.normal(keys[4], (H, K), dtype=jnp.float32)
    bc = 0.1 * jax.random.normal(keys[5], (1, K), dtype=jnp.float32)
    return (W, U, bz, bh, zeta, nu, Wc, bc)


def _check(T, B, D, H, K, *, time_chunk, batch_tile):
    key = jax.random.PRNGKey(0)
    kx, kp = jax.random.split(key)
    x = jax.random.normal(kx, (T, B, D), dtype=jnp.float32)
    params = _make_params(kp, D, H, K)

    out = jax.block_until_ready(
        keyword_spotter_forward(x, params, time_chunk=time_chunk,
                                batch_tile=batch_tile))
    assert out.shape == (B, K)

    # Tight check vs. a reference matching the kernel's matmul precision.
    ref_bf16 = jax.block_until_ready(
        keyword_spotter_reference(x, params, matmul_dtype=jnp.bfloat16))
    np.testing.assert_allclose(np.asarray(out), np.asarray(ref_bf16),
                               rtol=5e-3, atol=5e-3)

    # Looser sanity check vs. the pure-f32 reference (module semantics).
    ref_f32 = jax.block_until_ready(
        keyword_spotter_reference(x, params, matmul_dtype=jnp.float32))
    np.testing.assert_allclose(np.asarray(out), np.asarray(ref_f32),
                               rtol=5e-2, atol=5e-2)


if __name__ == "__main__":
    # Small canonical KWS shapes (time-major audio features).
    _check(T=8, B=2, D=32, H=32, K=16, time_chunk=64, batch_tile=32)
    # Exercise the pipelined grid: multiple time chunks (with tail masking),
    # multiple batch blocks, and padded H / K.
    _check(T=25, B=10, D=40, H=48, K=12, time_chunk=8, batch_tile=8)
    print("KERNEL_OK")
</pallas_src>

<mosaic_0001>
module attributes {stable_mosaic.version = 11 : i64} {
  func.func @kws_kernel(%arg0: i32, %arg1: i32, %arg2: memref<8x8x32xbf16, #tpu.memory_space<vmem>>, %arg3: memref<32x128xbf16, #tpu.memory_space<vmem>>, %arg4: memref<128x128xbf16, #tpu.memory_space<vmem>>, %arg5: memref<1x128xf32, #tpu.memory_space<vmem>>, %arg6: memref<1x128xf32, #tpu.memory_space<vmem>>, %arg7: memref<1x128xf32, #tpu.memory_space<vmem>>, %arg8: memref<1x128xf32, #tpu.memory_space<vmem>>, %arg9: memref<128x128xbf16, #tpu.memory_space<vmem>>, %arg10: memref<1x128xf32, #tpu.memory_space<vmem>>, %arg11: memref<8x128xf32, #tpu.memory_space<vmem>>, %arg12: memref<8x128xf32, #tpu.memory_space<vmem>>, %arg13: memref<8x8x128xf32, #tpu.memory_space<vmem>>) attributes {dimension_semantics = [#tpu.dimension_semantics<parallel>, #tpu.dimension_semantics<arbitrary>], iteration_bounds = array<i64: 1, 1>, scalar_prefetch = 0 : i64, scratch_operands = 2 : i64, tpu.core_type = #tpu.core_type<tc>, window_params = [{transform_indices = @transform_0, window_bounds = array<i64: 8, 8, 32>}, {pipeline_mode = #tpu.pipeline_mode<synchronous>, transform_indices = @transform_1, window_bounds = array<i64: 32, 128>}, {pipeline_mode = #tpu.pipeline_mode<synchronous>, transform_indices = @transform_2, window_bounds = array<i64: 128, 128>}, {pipeline_mode = #tpu.pipeline_mode<synchronous>, transform_indices = @transform_3, window_bounds = array<i64: 1, 128>}, {pipeline_mode = #tpu.pipeline_mode<synchronous>, transform_indices = @transform_4, window_bounds = array<i64: 1, 128>}, {pipeline_mode = #tpu.pipeline_mode<synchronous>, transform_indices = @transform_5, window_bounds = array<i64: 1, 128>}, {pipeline_mode = #tpu.pipeline_mode<synchronous>, transform_indices = @transform_6, window_bounds = array<i64: 1, 128>}, {pipeline_mode = #tpu.pipeline_mode<synchronous>, transform_indices = @transform_7, window_bounds = array<i64: 128, 128>}, {pipeline_mode = #tpu.pipeline_mode<synchronous>, transform_indices = @transform_8, window_bounds = array<i64: 1, 128>}, {transform_indices = @transform_9, window_bounds = array<i64: 8, 128>}]} {
    %c0_i32 = arith.constant 0 : i32
    %0 = arith.cmpi eq, %arg1, %c0_i32 : i32
    %1 = arith.extui %0 : i1 to i32
    %c0_i32_0 = arith.constant 0 : i32
    %2 = arith.cmpi ne, %1, %c0_i32_0 : i32
    scf.if %2 {
      %cst_79 = arith.constant 0.000000e+00 : f32
      %194 = vector.broadcast %cst_79 : f32 to vector<8x128xf32>
      %c0_80 = arith.constant 0 : index
      %c0_81 = arith.constant 0 : index
      %195 = vector.load %arg12[%c0_80, %c0_81] : memref<8x128xf32, #tpu.memory_space<vmem>>, vector<8x128xf32>
      tpu.vector_store %arg12[%c0_80, %c0_81], %194 {strides = array<i32>} : memref<8x128xf32, #tpu.memory_space<vmem>>, vector<8x128xf32>,
    } else {
    }
    %c0 = arith.constant 0 : index
    %c0_1 = arith.constant 0 : index
    %c0_2 = arith.constant 0 : index
    %3 = vector.load %arg2[%c0, %c0_1, %c0_2] : memref<8x8x32xbf16, #tpu.memory_space<vmem>>, vector<8x8x32xbf16>
    %4 = vector.shape_cast %3 : vector<8x8x32xbf16> to vector<64x32xbf16>
    %c0_3 = arith.constant 0 : index
    %c0_4 = arith.constant 0 : index
    %5 = vector.load %arg3[%c0_3, %c0_4] : memref<32x128xbf16, #tpu.memory_space<vmem>>, vector<32x128xbf16>
    %cst = arith.constant dense<0.000000e+00> : vector<64x128xf32>
    %6 = tpu.matmul %4, %5, %cst {dimension_numbers = #tpu.dot_dimension_numbers<[1], [0], [0], [1], [0, 0, 1, 1], [], []>} : vector<64x32xbf16>, vector<32x128xbf16>, vector<64x128xf32> -> vector<64x128xf32>
    %c0_5 = arith.constant 0 : index
    %c0_6 = arith.constant 0 : index
    %7 = vector.load %arg5[%c0_5, %c0_6] : memref<1x128xf32, #tpu.memory_space<vmem>>, vector<1x128xf32>
    %8 = vector.broadcast %7 : vector<1x128xf32> to vector<64x128xf32>
    %9 = arith.addf %6, %8 : vector<64x128xf32>
    %10 = vector.shape_cast %9 : vector<64x128xf32> to vector<8x8x128xf32>
    %c0_7 = arith.constant 0 : index
    %c0_8 = arith.constant 0 : index
    %c0_9 = arith.constant 0 : index
    %11 = vector.load %arg13[%c0_7, %c0_8, %c0_9] : memref<8x8x128xf32, #tpu.memory_space<vmem>>, vector<8x8x128xf32>
    tpu.vector_store %arg13[%c0_7, %c0_8, %c0_9], %10 {strides = array<i32>} : memref<8x8x128xf32, #tpu.memory_space<vmem>>, vector<8x8x128xf32>,
    %c0_10 = arith.constant 0 : index
    %c0_11 = arith.constant 0 : index
    %12 = vector.load %arg7[%c0_10, %c0_11] : memref<1x128xf32, #tpu.memory_space<vmem>>, vector<1x128xf32>
    %13 = vector.shape_cast %12 : vector<1x128xf32> to vector<1x128xf32>
    %14 = vector.broadcast %13 : vector<1x128xf32> to vector<8x128xf32>
    %c0_12 = arith.constant 0 : index
    %c0_13 = arith.constant 0 : index
    %15 = vector.load %arg8[%c0_12, %c0_13] : memref<1x128xf32, #tpu.memory_space<vmem>>, vector<1x128xf32>
    %16 = vector.shape_cast %15 : vector<1x128xf32> to vector<1x128xf32>
    %17 = vector.broadcast %16 : vector<1x128xf32> to vector<8x128xf32>
    %c0_14 = arith.constant 0 : index
    %c0_15 = arith.constant 0 : index
    %18 = vector.load %arg6[%c0_14, %c0_15] : memref<1x128xf32, #tpu.memory_space<vmem>>, vector<1x128xf32>
    %19 = vector.shape_cast %18 : vector<1x128xf32> to vector<1x128xf32>
    %20 = vector.broadcast %19 : vector<1x128xf32> to vector<8x128xf32>
    %c0_16 = arith.constant 0 : index
    %c0_17 = arith.constant 0 : index
    %21 = vector.load %arg12[%c0_16, %c0_17] : memref<8x128xf32, #tpu.memory_space<vmem>>, vector<8x128xf32>
    %c0_i32_18 = arith.constant 0 : i32
    %22 = arith.index_cast %c0_i32_18 : i32 to index
    %c0_19 = arith.constant 0 : index
    %c0_20 = arith.constant 0 : index
    %23 = vector.load %arg13[%22, %c0_19, %c0_20] : memref<8x8x128xf32, #tpu.memory_space<vmem>>, vector<1x8x128xf32>
    %24 = vector.shape_cast %23 : vector<1x8x128xf32> to vector<8x128xf32>
    %25 = arith.truncf %21 : vector<8x128xf32> to vector<8x128xbf16>
    %c0_21 = arith.constant 0 : index
    %c0_22 = arith.constant 0 : index
    %26 = vector.load %arg4[%c0_21, %c0_22] : memref<128x128xbf16, #tpu.memory_space<vmem>>, vector<128x128xbf16>
    %cst_23 = arith.constant dense<0.000000e+00> : vector<8x128xf32>
    %27 = tpu.matmul %25, %26, %cst_23 {dimension_numbers = #tpu.dot_dimension_numbers<[1], [0], [0], [1], [0, 0, 1, 1], [], []>} : vector<8x128xbf16>, vector<128x128xbf16>, vector<8x128xf32> -> vector<8x128xf32>
    %28 = arith.addf %24, %27 : vector<8x128xf32>
    %29 = arith.negf %28 : vector<8x128xf32>
    %30 = math.exp %29 : vector<8x128xf32>
    %cst_24 = arith.constant 1.000000e+00 : f32
    %31 = vector.broadcast %cst_24 : f32 to vector<8x128xf32>
    %32 = arith.addf %31, %30 : vector<8x128xf32>
    %33 = arith.divf %31, %32 : vector<8x128xf32>
    %34 = arith.addf %28, %20 : vector<8x128xf32>
    %35 = math.tanh %34 : vector<8x128xf32>
    %cst_25 = arith.constant 1.000000e+00 : f32
    %36 = vector.broadcast %cst_25 : f32 to vector<8x128xf32>
    %37 = arith.subf %36, %33 : vector<8x128xf32>
    %38 = arith.mulf %14, %37 : vector<8x128xf32>
    %39 = arith.addf %38, %17 : vector<8x128xf32>
    %40 = arith.mulf %39, %35 : vector<8x128xf32>
    %41 = arith.mulf %33, %21 : vector<8x128xf32>
    %42 = arith.addf %40, %41 : vector<8x128xf32>
    %c1_i32 = arith.constant 1 : i32
    %43 = arith.index_cast %c1_i32 : i32 to index
    %c0_26 = arith.constant 0 : index
    %c0_27 = arith.constant 0 : index
    %44 = vector.load %arg13[%43, %c0_26, %c0_27] : memref<8x8x128xf32, #tpu.memory_space<vmem>>, vector<1x8x128xf32>
    %45 = vector.shape_cast %44 : vector<1x8x128xf32> to vector<8x128xf32>
    %46 = arith.truncf %42 : vector<8x128xf32> to vector<8x128xbf16>
    %c0_28 = arith.constant 0 : index
    %c0_29 = arith.constant 0 : index
    %47 = vector.load %arg4[%c0_28, %c0_29] : memref<128x128xbf16, #tpu.memory_space<vmem>>, vector<128x128xbf16>
    %cst_30 = arith.constant dense<0.000000e+00> : vector<8x128xf32>
    %48 = tpu.matmul %46, %47, %cst_30 {dimension_numbers = #tpu.dot_dimension_numbers<[1], [0], [0], [1], [0, 0, 1, 1], [], []>} : vector<8x128xbf16>, vector<128x128xbf16>, vector<8x128xf32> -> vector<8x128xf32>
    %49 = arith.addf %45, %48 : vector<8x128xf32>
    %50 = arith.negf %49 : vector<8x128xf32>
    %51 = math.exp %50 : vector<8x128xf32>
    %cst_31 = arith.constant 1.000000e+00 : f32
    %52 = vector.broadcast %cst_31 : f32 to vector<8x128xf32>
    %53 = arith.addf %52, %51 : vector<8x128xf32>
    %54 = arith.divf %52, %53 : vector<8x128xf32>
    %55 = arith.addf %49, %20 : vector<8x128xf32>
    %56 = math.tanh %55 : vector<8x128xf32>
    %cst_32 = arith.constant 1.000000e+00 : f32
    %57 = vector.broadcast %cst_32 : f32 to vector<8x128xf32>
    %58 = arith.subf %57, %54 : vector<8x128xf32>
    %59 = arith.mulf %14, %58 : vector<8x128xf32>
    %60 = arith.addf %59, %17 : vector<8x128xf32>
    %61 = arith.mulf %60, %56 : vector<8x128xf32>
    %62 = arith.mulf %54, %42 : vector<8x128xf32>
    %63 = arith.addf %61, %62 : vector<8x128xf32>
    %c2_i32 = arith.constant 2 : i32
    %64 = arith.index_cast %c2_i32 : i32 to index
    %c0_33 = arith.constant 0 : index
    %c0_34 = arith.constant 0 : index
    %65 = vector.load %arg13[%64, %c0_33, %c0_34] : memref<8x8x128xf32, #tpu.memory_space<vmem>>, vector<1x8x128xf32>
    %66 = vector.shape_cast %65 : vector<1x8x128xf32> to vector<8x128xf32>
    %67 = arith.truncf %63 : vector<8x128xf32> to vector<8x128xbf16>
    %c0_35 = arith.constant 0 : index
    %c0_36 = arith.constant 0 : index
    %68 = vector.load %arg4[%c0_35, %c0_36] : memref<128x128xbf16, #tpu.memory_space<vmem>>, vector<128x128xbf16>
    %cst_37 = arith.constant dense<0.000000e+00> : vector<8x128xf32>
    %69 = tpu.matmul %67, %68, %cst_37 {dimension_numbers = #tpu.dot_dimension_numbers<[1], [0], [0], [1], [0, 0, 1, 1], [], []>} : vector<8x128xbf16>, vector<128x128xbf16>, vector<8x128xf32> -> vector<8x128xf32>
    %70 = arith.addf %66, %69 : vector<8x128xf32>
    %71 = arith.negf %70 : vector<8x128xf32>
    %72 = math.exp %71 : vector<8x128xf32>
    %cst_38 = arith.constant 1.000000e+00 : f32
    %73 = vector.broadcast %cst_38 : f32 to vector<8x128xf32>
    %74 = arith.addf %73, %72 : vector<8x128xf32>
    %75 = arith.divf %73, %74 : vector<8x128xf32>
    %76 = arith.addf %70, %20 : vector<8x128xf32>
    %77 = math.tanh %76 : vector<8x128xf32>
    %cst_39 = arith.constant 1.000000e+00 : f32
    %78 = vector.broadcast %cst_39 : f32 to vector<8x128xf32>
    %79 = arith.subf %78, %75 : vector<8x128xf32>
    %80 = arith.mulf %14, %79 : vector<8x128xf32>
    %81 = arith.addf %80, %17 : vector<8x128xf32>
    %82 = arith.mulf %81, %77 : vector<8x128xf32>
    %83 = arith.mulf %75, %63 : vector<8x128xf32>
    %84 = arith.addf %82, %83 : vector<8x128xf32>
    %c3_i32 = arith.constant 3 : i32
    %85 = arith.index_cast %c3_i32 : i32 to index
    %c0_40 = arith.constant 0 : index
    %c0_41 = arith.constant 0 : index
    %86 = vector.load %arg13[%85, %c0_40, %c0_41] : memref<8x8x128xf32, #tpu.memory_space<vmem>>, vector<1x8x128xf32>
    %87 = vector.shape_cast %86 : vector<1x8x128xf32> to vector<8x128xf32>
    %88 = arith.truncf %84 : vector<8x128xf32> to vector<8x128xbf16>
    %c0_42 = arith.constant 0 : index
    %c0_43 = arith.constant 0 : index
    %89 = vector.load %arg4[%c0_42, %c0_43] : memref<128x128xbf16, #tpu.memory_space<vmem>>, vector<128x128xbf16>
    %cst_44 = arith.constant dense<0.000000e+00> : vector<8x128xf32>
    %90 = tpu.matmul %88, %89, %cst_44 {dimension_numbers = #tpu.dot_dimension_numbers<[1], [0], [0], [1], [0, 0, 1, 1], [], []>} : vector<8x128xbf16>, vector<128x128xbf16>, vector<8x128xf32> -> vector<8x128xf32>
    %91 = arith.addf %87, %90 : vector<8x128xf32>
    %92 = arith.negf %91 : vector<8x128xf32>
    %93 = math.exp %92 : vector<8x128xf32>
    %cst_45 = arith.constant 1.000000e+00 : f32
    %94 = vector.broadcast %cst_45 : f32 to vector<8x128xf32>
    %95 = arith.addf %94, %93 : vector<8x128xf32>
    %96 = arith.divf %94, %95 : vector<8x128xf32>
    %97 = arith.addf %91, %20 : vector<8x128xf32>
    %98 = math.tanh %97 : vector<8x128xf32>
    %cst_46 = arith.constant 1.000000e+00 : f32
    %99 = vector.broadcast %cst_46 : f32 to vector<8x128xf32>
    %100 = arith.subf %99, %96 : vector<8x128xf32>
    %101 = arith.mulf %14, %100 : vector<8x128xf32>
    %102 = arith.addf %101, %17 : vector<8x128xf32>
    %103 = arith.mulf %102, %98 : vector<8x128xf32>
    %104 = arith.mulf %96, %84 : vector<8x128xf32>
    %105 = arith.addf %103, %104 : vector<8x128xf32>
    %c4_i32 = arith.constant 4 : i32
    %106 = arith.index_cast %c4_i32 : i32 to index
    %c0_47 = arith.constant 0 : index
    %c0_48 = arith.constant 0 : index
    %107 = vector.load %arg13[%106, %c0_47, %c0_48] : memref<8x8x128xf32, #tpu.memory_space<vmem>>, vector<1x8x128xf32>
    %108 = vector.shape_cast %107 : vector<1x8x128xf32> to vector<8x128xf32>
    %109 = arith.truncf %105 : vector<8x128xf32> to vector<8x128xbf16>
    %c0_49 = arith.constant 0 : index
    %c0_50 = arith.constant 0 : index
    %110 = vector.load %arg4[%c0_49, %c0_50] : memref<128x128xbf16, #tpu.memory_space<vmem>>, vector<128x128xbf16>
    %cst_51 = arith.constant dense<0.000000e+00> : vector<8x128xf32>
    %111 = tpu.matmul %109, %110, %cst_51 {dimension_numbers = #tpu.dot_dimension_numbers<[1], [0], [0], [1], [0, 0, 1, 1], [], []>} : vector<8x128xbf16>, vector<128x128xbf16>, vector<8x128xf32> -> vector<8x128xf32>
    %112 = arith.addf %108, %111 : vector<8x128xf32>
    %113 = arith.negf %112 : vector<8x128xf32>
    %114 = math.exp %113 : vector<8x128xf32>
    %cst_52 = arith.constant 1.000000e+00 : f32
    %115 = vector.broadcast %cst_52 : f32 to vector<8x128xf32>
    %116 = arith.addf %115, %114 : vector<8x128xf32>
    %117 = arith.divf %115, %116 : vector<8x128xf32>
    %118 = arith.addf %112, %20 : vector<8x128xf32>
    %119 = math.tanh %118 : vector<8x128xf32>
    %cst_53 = arith.constant 1.000000e+00 : f32
    %120 = vector.broadcast %cst_53 : f32 to vector<8x128xf32>
    %121 = arith.subf %120, %117 : vector<8x128xf32>
    %122 = arith.mulf %14, %121 : vector<8x128xf32>
    %123 = arith.addf %122, %17 : vector<8x128xf32>
    %124 = arith.mulf %123, %119 : vector<8x128xf32>
    %125 = arith.mulf %117, %105 : vector<8x128xf32>
    %126 = arith.addf %124, %125 : vector<8x128xf32>
    %c5_i32 = arith.constant 5 : i32
    %127 = arith.index_cast %c5_i32 : i32 to index
    %c0_54 = arith.constant 0 : index
    %c0_55 = arith.constant 0 : index
    %128 = vector.load %arg13[%127, %c0_54, %c0_55] : memref<8x8x128xf32, #tpu.memory_space<vmem>>, vector<1x8x128xf32>
    %129 = vector.shape_cast %128 : vector<1x8x128xf32> to vector<8x128xf32>
    %130 = arith.truncf %126 : vector<8x128xf32> to vector<8x128xbf16>
    %c0_56 = arith.constant 0 : index
    %c0_57 = arith.constant 0 : index
    %131 = vector.load %arg4[%c0_56, %c0_57] : memref<128x128xbf16, #tpu.memory_space<vmem>>, vector<128x128xbf16>
    %cst_58 = arith.constant dense<0.000000e+00> : vector<8x128xf32>
    %132 = tpu.matmul %130, %131, %cst_58 {dimension_numbers = #tpu.dot_dimension_numbers<[1], [0], [0], [1], [0, 0, 1, 1], [], []>} : vector<8x128xbf16>, vector<128x128xbf16>, vector<8x128xf32> -> vector<8x128xf32>
    %133 = arith.addf %129, %132 : vector<8x128xf32>
    %134 = arith.negf %133 : vector<8x128xf32>
    %135 = math.exp %134 : vector<8x128xf32>
    %cst_59 = arith.constant 1.000000e+00 : f32
    %136 = vector.broadcast %cst_59 : f32 to vector<8x128xf32>
    %137 = arith.addf %136, %135 : vector<8x128xf32>
    %138 = arith.divf %136, %137 : vector<8x128xf32>
    %139 = arith.addf %133, %20 : vector<8x128xf32>
    %140 = math.tanh %139 : vector<8x128xf32>
    %cst_60 = arith.constant 1.000000e+00 : f32
    %141 = vector.broadcast %cst_60 : f32 to vector<8x128xf32>
    %142 = arith.subf %141, %138 : vector<8x128xf32>
    %143 = arith.mulf %14, %142 : vector<8x128xf32>
    %144 = arith.addf %143, %17 : vector<8x128xf32>
    %145 = arith.mulf %144, %140 : vector<8x128xf32>
    %146 = arith.mulf %138, %126 : vector<8x128xf32>
    %147 = arith.addf %145, %146 : vector<8x128xf32>
    %c6_i32 = arith.constant 6 : i32
    %148 = arith.index_cast %c6_i32 : i32 to index
    %c0_61 = arith.constant 0 : index
    %c0_62 = arith.constant 0 : index
    %149 = vector.load %arg13[%148, %c0_61, %c0_62] : memref<8x8x128xf32, #tpu.memory_space<vmem>>, vector<1x8x128xf32>
    %150 = vector.shape_cast %149 : vector<1x8x128xf32> to vector<8x128xf32>
    %151 = arith.truncf %147 : vector<8x128xf32> to vector<8x128xbf16>
    %c0_63 = arith.constant 0 : index
    %c0_64 = arith.constant 0 : index
    %152 = vector.load %arg4[%c0_63, %c0_64] : memref<128x128xbf16, #tpu.memory_space<vmem>>, vector<128x128xbf16>
    %cst_65 = arith.constant dense<0.000000e+00> : vector<8x128xf32>
    %153 = tpu.matmul %151, %152, %cst_65 {dimension_numbers = #tpu.dot_dimension_numbers<[1], [0], [0], [1], [0, 0, 1, 1], [], []>} : vector<8x128xbf16>, vector<128x128xbf16>, vector<8x128xf32> -> vector<8x128xf32>
    %154 = arith.addf %150, %153 : vector<8x128xf32>
    %155 = arith.negf %154 : vector<8x128xf32>
    %156 = math.exp %155 : vector<8x128xf32>
    %cst_66 = arith.constant 1.000000e+00 : f32
    %157 = vector.broadcast %cst_66 : f32 to vector<8x128xf32>
    %158 = arith.addf %157, %156 : vector<8x128xf32>
    %159 = arith.divf %157, %158 : vector<8x128xf32>
    %160 = arith.addf %154, %20 : vector<8x128xf32>
    %161 = math.tanh %160 : vector<8x128xf32>
    %cst_67 = arith.constant 1.000000e+00 : f32
    %162 = vector.broadcast %cst_67 : f32 to vector<8x128xf32>
    %163 = arith.subf %162, %159 : vector<8x128xf32>
    %164 = arith.mulf %14, %163 : vector<8x128xf32>
    %165 = arith.addf %164, %17 : vector<8x128xf32>
    %166 = arith.mulf %165, %161 : vector<8x128xf32>
    %167 = arith.mulf %159, %147 : vector<8x128xf32>
    %168 = arith.addf %166, %167 : vector<8x128xf32>
    %c7_i32 = arith.constant 7 : i32
    %169 = arith.index_cast %c7_i32 : i32 to index
    %c0_68 = arith.constant 0 : index
    %c0_69 = arith.constant 0 : index
    %170 = vector.load %arg13[%169, %c0_68, %c0_69] : memref<8x8x128xf32, #tpu.memory_space<vmem>>, vector<1x8x128xf32>
    %171 = vector.shape_cast %170 : vector<1x8x128xf32> to vector<8x128xf32>
    %172 = arith.truncf %168 : vector<8x128xf32> to vector<8x128xbf16>
    %c0_70 = arith.constant 0 : index
    %c0_71 = arith.constant 0 : index
    %173 = vector.load %arg4[%c0_70, %c0_71] : memref<128x128xbf16, #tpu.memory_space<vmem>>, vector<128x128xbf16>
    %cst_72 = arith.constant dense<0.000000e+00> : vector<8x128xf32>
    %174 = tpu.matmul %172, %173, %cst_72 {dimension_numbers = #tpu.dot_dimension_numbers<[1], [0], [0], [1], [0, 0, 1, 1], [], []>} : vector<8x128xbf16>, vector<128x128xbf16>, vector<8x128xf32> -> vector<8x128xf32>
    %175 = arith.addf %171, %174 : vector<8x128xf32>
    %176 = arith.negf %175 : vector<8x128xf32>
    %177 = math.exp %176 : vector<8x128xf32>
    %cst_73 = arith.constant 1.000000e+00 : f32
    %178 = vector.broadcast %cst_73 : f32 to vector<8x128xf32>
    %179 = arith.addf %178, %177 : vector<8x128xf32>
    %180 = arith.divf %178, %179 : vector<8x128xf32>
    %181 = arith.addf %175, %20 : vector<8x128xf32>
    %182 = math.tanh %181 : vector<8x128xf32>
    %cst_74 = arith.constant 1.000000e+00 : f32
    %183 = vector.broadcast %cst_74 : f32 to vector<8x128xf32>
    %184 = arith.subf %183, %180 : vector<8x128xf32>
    %185 = arith.mulf %14, %184 : vector<8x128xf32>
    %186 = arith.addf %185, %17 : vector<8x128xf32>
    %187 = arith.mulf %186, %182 : vector<8x128xf32>
    %188 = arith.mulf %180, %168 : vector<8x128xf32>
    %189 = arith.addf %187, %188 : vector<8x128xf32>
    %c8_i32 = arith.constant 8 : i32
    %c0_75 = arith.constant 0 : index
    %c0_76 = arith.constant 0 : index
    %190 = vector.load %arg12[%c0_75, %c0_76] : memref<8x128xf32, #tpu.memory_space<vmem>>, vector<8x128xf32>
    tpu.vector_store %arg12[%c0_75, %c0_76], %189 {strides = array<i32>} : memref<8x128xf32, #tpu.memory_space<vmem>>, vector<8x128xf32>,
    %c0_i32_77 = arith.constant 0 : i32
    %191 = arith.cmpi eq, %arg1, %c0_i32_77 : i32
    %192 = arith.extui %191 : i1 to i32
    %c0_i32_78 = arith.constant 0 : i32
    %193 = arith.cmpi ne, %192, %c0_i32_78 : i32
    scf.if %193 {
      %194 = arith.truncf %189 : vector<8x128xf32> to vector<8x128xbf16>
      %c0_79 = arith.constant 0 : index
      %c0_80 = arith.constant 0 : index
      %195 = vector.load %arg9[%c0_79, %c0_80] : memref<128x128xbf16, #tpu.memory_space<vmem>>, vector<128x128xbf16>
      %cst_81 = arith.constant dense<0.000000e+00> : vector<8x128xf32>
      %196 = tpu.matmul %194, %195, %cst_81 {dimension_numbers = #tpu.dot_dimension_numbers<[1], [0], [0], [1], [0, 0, 1, 1], [], []>} : vector<8x128xbf16>, vector<128x128xbf16>, vector<8x128xf32> -> vector<8x128xf32>
      %c0_82 = arith.constant 0 : index
      %c0_83 = arith.constant 0 : index
      %197 = vector.load %arg10[%c0_82, %c0_83] : memref<1x128xf32, #tpu.memory_space<vmem>>, vector<1x128xf32>
      %198 = vector.broadcast %197 : vector<1x128xf32> to vector<8x128xf32>
      %199 = arith.addf %196, %198 : vector<8x128xf32>
      %cst_84 = arith.constant dense<0xFF800000> : vector<8xf32>
      %200 = vector.multi_reduction <maximumf>, %199, %cst_84 [1] : vector<8x128xf32> to vector<8xf32>
      %201 = vector.shape_cast %200 : vector<8xf32> to vector<8x1xf32>
      %202 = vector.broadcast %201 : vector<8x1xf32> to vector<8x128xf32>
      %203 = arith.subf %199, %202 : vector<8x128xf32>
      %204 = math.exp %203 : vector<8x128xf32>
      %cst_85 = arith.constant dense<0.000000e+00> : vector<8xf32>
      %205 = vector.multi_reduction <add>, %204, %cst_85 [1] : vector<8x128xf32> to vector<8xf32>
      %206 = vector.shape_cast %205 : vector<8xf32> to vector<8x1xf32>
      %207 = math.log %206 : vector<8x1xf32>
      %208 = vector.broadcast %207 : vector<8x1xf32> to vector<8x128xf32>
      %209 = arith.subf %203, %208 : vector<8x128xf32>
      %c0_86 = arith.constant 0 : index
      %c0_87 = arith.constant 0 : index
      %210 = vector.load %arg11[%c0_86, %c0_87] : memref<8x128xf32, #tpu.memory_space<vmem>>, vector<8x128xf32>
      tpu.vector_store %arg11[%c0_86, %c0_87], %209 {strides = array<i32>} : memref<8x128xf32, #tpu.memory_space<vmem>>, vector<8x128xf32>,
    } else {
    }
    return
  }
  func.func @transform_0(%arg0: i32, %arg1: i32) -> (i32, i32, i32) {
    %c0_i32 = arith.constant 0 : i32
    %c0_i32_0 = arith.constant 0 : i32
    return %arg1, %arg0, %c0_i32 : i32, i32, i32
  }
  func.func @transform_1(%arg0: i32, %arg1: i32) -> (i32, i32) {
    %c0_i32 = arith.constant 0 : i32
    %c0_i32_0 = arith.constant 0 : i32
    %c0_i32_1 = arith.constant 0 : i32
    return %c0_i32, %c0_i32_0 : i32, i32
  }
  func.func @transform_2(%arg0: i32, %arg1: i32) -> (i32, i32) {
    %c0_i32 = arith.constant 0 : i32
    %c0_i32_0 = arith.constant 0 : i32
    %c0_i32_1 = arith.constant 0 : i32
    return %c0_i32, %c0_i32_0 : i32, i32
  }
  func.func @transform_3(%arg0: i32, %arg1: i32) -> (i32, i32) {
    %c0_i32 = arith.constant 0 : i32
    %c0_i32_0 = arith.constant 0 : i32
    %c0_i32_1 = arith.constant 0 : i32
    return %c0_i32, %c0_i32_0 : i32, i32
  }
  func.func @transform_4(%arg0: i32, %arg1: i32) -> (i32, i32) {
    %c0_i32 = arith.constant 0 : i32
    %c0_i32_0 = arith.constant 0 : i32
    %c0_i32_1 = arith.constant 0 : i32
    return %c0_i32, %c0_i32_0 : i32, i32
  }
  func.func @transform_5(%arg0: i32, %arg1: i32) -> (i32, i32) {
    %c0_i32 = arith.constant 0 : i32
    %c0_i32_0 = arith.constant 0 : i32
    %c0_i32_1 = arith.constant 0 : i32
    return %c0_i32, %c0_i32_0 : i32, i32
  }
  func.func @transform_6(%arg0: i32, %arg1: i32) -> (i32, i32) {
    %c0_i32 = arith.constant 0 : i32
    %c0_i32_0 = arith.constant 0 : i32
    %c0_i32_1 = arith.constant 0 : i32
    return %c0_i32, %c0_i32_0 : i32, i32
  }
  func.func @transform_7(%arg0: i32, %arg1: i32) -> (i32, i32) {
    %c0_i32 = arith.constant 0 : i32
    %c0_i32_0 = arith.constant 0 : i32
    %c0_i32_1 = arith.constant 0 : i32
    return %c0_i32, %c0_i32_0 : i32, i32
  }
  func.func @transform_8(%arg0: i32, %arg1: i32) -> (i32, i32) {
    %c0_i32 = arith.constant 0 : i32
    %c0_i32_0 = arith.constant 0 : i32
    %c0_i32_1 = arith.constant 0 : i32
    return %c0_i32, %c0_i32_0 : i32, i32
  }
  func.func @transform_9(%arg0: i32, %arg1: i32) -> (i32, i32) {
    %c0_i32 = arith.constant 0 : i32
    %c0_i32_0 = arith.constant 0 : i32
    return %arg0, %c0_i32 : i32, i32
  }
}

</mosaic_0001>

<bundles_post_ra>
// kernel: tpu_custom_call.1
= control target key start
LH: loop header
LB: loop body
LE: loop exit
PB: predicated region body
PF: predicated region fallthrough
CT: control target
= control target key end

     0   :  { %14 = vsyncpa [#allocation5], 0  ;;  %s1221_s0 = inlined_call_operand.hbm [shape: bf16[8,8,32], index: 0, kind: input, shape index: {}]   ;;  %s1222_s1 = inlined_call_operand.hbm [shape: bf16[32,128], index: 1, kind: input, shape index: {}]   ;;  %s1223_s2 = inlined_call_operand.hbm [shape: bf16[128,128], index: 2, kind: input, shape index: {}]   ;;  %s1224_s3 = inlined_call_operand.vmem [shape: f32[1,128], index: 3, kind: input, shape index: {}]   ;;  %s1225_s4 = inlined_call_operand.vmem [shape: f32[1,128], index: 4, kind: input, shape index: {}]   ;;  %s1226_s5 = inlined_call_operand.vmem [shape: f32[1,128], index: 5, kind: input, shape index: {}]   ;;  %s1227_s6 = inlined_call_operand.vmem [shape: f32[1,128], index: 6, kind: input, shape index: {}]   ;;  %s1228_s7 = inlined_call_operand.hbm [shape: bf16[128,128], index: 7, kind: input, shape index: {}]   ;;  %s1229_s8 = inlined_call_operand.vmem [shape: f32[1,128], index: 8, kind: input, shape index: {}]   ;;  %s1230_s9 = inlined_call_operand.hbm [shape: f32[8,128], index: 9, kind: output, shape index: {}]  }
   0x1   :  { %15 = vsyncpa [#allocation8], 0 }
   0x2   :  { %16 = vsyncpa [#allocation11], 0 }
   0x3   :  { %17 = vsyncpa [#allocation6], 0  ;;  %s35_s11 = sshll.u32 %s1222_s1, 4  ;;  %s1059_s12 = smov [#allocation7]   ;;  %s36_s11 = int_to_ptr.hbm [resolvable:$true] %s35_s11 }
   0x4   :  { %s37_s13 = sshll.u32 %s1059_s12, 4  ;;  %s22_s16 = sshll.u32 %s1221_s0, 4  ;;  %s38_s13 = int_to_ptr.vmem [resolvable:$true] %s37_s13  ;;  %s23_s16 = int_to_ptr.hbm [resolvable:$true] %s22_s16 }
   0x5   :  { %s1060_s17 = smov 64   ;;  %s1061_s18 = smov 4  }
   0x6   :  { %43 = dma.hbm_to_vmem [thread:$0]  %s36_s11, 256, %s38_s13, [#allocation8], %s1060_s17, %s1060_s17, %s1061_s18  }
   0x7   :  { %s1062_s19 = smov [#allocation4]   ;;  %s48_s23 = sshll.u32 %s1223_s2, 4  ;;  %s49_s23 = int_to_ptr.hbm [resolvable:$true] %s48_s23 }
   0x8   :  { %s24_s20 = sshll.u32 %s1062_s19, 4  ;;  %s69_s25 = sshll.u32 %s1228_s7, 4  ;;  %s25_s20 = int_to_ptr.vmem [resolvable:$true] %s24_s20  ;;  %s70_s25 = int_to_ptr.hbm [resolvable:$true] %s69_s25 }
   0x9   :  { %30 = dma.hbm_to_vmem [thread:$0]  %s23_s16, 512, %s25_s20, [#allocation5], %s1060_s17, %s1060_s17, %s1061_s18  }
   0xa   :  { %s1063_s26 = smov [#allocation9]   ;;  %s1064_s0 = smov [#allocation10]  }
   0xb   :  { %s50_s27 = sshll.u32 %s1063_s26, 4  ;;  %s71_s28 = sshll.u32 %s1064_s0, 4  ;;  %s51_s27 = int_to_ptr.vmem [resolvable:$true] %s50_s27  ;;  %s72_s28 = int_to_ptr.vmem [resolvable:$true] %s71_s28 }
   0xc   :  { %56 = dma.hbm_to_vmem [thread:$0]  %s49_s23, 1024, %s51_s27, [#allocation8], %s1060_s17, %s1060_s17, %s1061_s18  }
   0xd   :  { %77 = dma.hbm_to_vmem [thread:$0]  %s70_s25, 1024, %s72_s28, [#allocation11], %s1060_s17, %s1060_s17, %s1061_s18  }
   0xe   :  { %1051 = dma.done.wait [#allocation5], 512  }
   0xf   :  { %1052 = vsyncadd [#allocation5], 4294966784 }
  0x10   :  { %1053 = dma.done.wait [#allocation8], 1280  }
  0x11   :  { %1054 = vsyncadd [#allocation8], 4294966016 }
  0x12   :  { %1055 = dma.done.wait [#allocation11], 1024  }
  0x13   :  { %1056 = vsyncadd [#allocation11], 4294966272  ;;  %v1129_v0 = vld [vmem:[#allocation9 + $0x38] sm:$0xff]  ;;  %v1132_v2 = vld [vmem:[#allocation9 + $0x30] sm:$0xff]  ;;  %vm150_vm0 = vcmask 261120   ;;  %v1065_v11 = vmov 0.0|0.0  }
  0x14   :  { %v849_v1 = vld [vmem:[#allocation7 + $0x8] sm:$0xff]  ;;  %279 = vmatpush.bf16.msra.mxu1 %v1129_v0  ;;  %323 = vmatpush.bf16.msra.mxu2 %v1129_v0  ;;  %v848_v3 = vld [vmem:[#allocation7] sm:$0xff]  ;;  %v1137_v4 = vld [vmem:[#allocation9 + $0x28] sm:$0xff]  ;;  %s1066_s12 = smov [#allocation12]   ;;  %s732_s16 = sshll.u32 %s1230_s9, 4  ;;  %s733_s16 = int_to_ptr.hbm [resolvable:$true] %s732_s16 }
  0x15   :  { %169 = vmatpush.bf16.msra.mxu0 %v849_v1  ;;  %367 = vmatpush.bf16.msra.mxu3 %v1129_v0  ;;  %v844_v5 = vld [vmem:[#allocation4] sm:$0xff]  ;;  %v854_v6 = vld [vmem:[#allocation9 + $0x20] sm:$0xff]  ;;  %v853_v7 = vld [vmem:[#allocation9 + $0x18] sm:$0xff]  ;;  %s730_s13 = sshll.u32 %s1066_s12, 4  ;;  %s731_s13 = int_to_ptr.vmem [resolvable:$true] %s730_s13 }
  0x16   :  { %v852_v8 = vld [vmem:[#allocation9 + $0x10] sm:$0xff]  ;;  %v851_v9 = vld [vmem:[#allocation9 + $0x8] sm:$0xff]  ;;  %v850_v10 = vld [vmem:[#allocation9] sm:$0xff] }
  0x17   :  { %v1163_v12 = vld [vmem:[%s1224_s3] ss:$0 sm:$0xff]  ;;  %v845_v43 = vld [vmem:[#allocation4 + $0x8] sm:$0xff] }
  0x18   :  { %280 = vmatpush.bf16.msra.mxu1 %v1132_v2  ;;  %324 = vmatpush.bf16.msra.mxu2 %v1132_v2  ;;  %v1169_v23 = vld [vmem:[%s1225_s4] ss:$0 sm:$0xff] }
  0x19   :  { %170 = vmatpush.bf16.msra.mxu0 %v848_v3  ;;  %368 = vmatpush.bf16.msra.mxu3 %v1132_v2  ;;  %v1175_v31 = vld [vmem:[%s1226_s5] ss:$0 sm:$0xff] }
  0x1a   :  { %v1180_v34 = vld [vmem:[%s1227_s6] ss:$0 sm:$0xff] }
  0x1c   :  { %281 = vmatpush.bf16.msra.mxu1 %v1137_v4  ;;  %768 = vmatmul.msk.bf16.vlgmr.msra.gmra.mxu0 %vm150_vm0, %v844_v5 }
  0x1d   :  { %543 = vmatpush.bf16.msrb.mxu0 %v1129_v0  ;;  %325 = vmatpush.bf16.msra.mxu2 %v1137_v4 }
  0x1e   :  { %369 = vmatpush.bf16.msra.mxu3 %v1137_v4 }
  0x20   :  { %282 = vmatpush.bf16.msra.mxu1 %v854_v6 }
  0x21   :  { %544 = vmatpush.bf16.msrb.mxu0 %v1132_v2  ;;  %326 = vmatpush.bf16.msra.mxu2 %v854_v6 }
  0x22   :  { %370 = vmatpush.bf16.msra.mxu3 %v854_v6 }
  0x24   :  { %283 = vmatpush.bf16.msra.mxu1 %v853_v7 }
  0x25   :  { %545 = vmatpush.bf16.msrb.mxu0 %v1137_v4  ;;  %327 = vmatpush.bf16.msra.mxu2 %v853_v7 }
  0x26   :  { %371 = vmatpush.bf16.msra.mxu3 %v853_v7 }
  0x28   :  { %284 = vmatpush.bf16.msra.mxu1 %v852_v8 }
  0x29   :  { %546 = vmatpush.bf16.msrb.mxu0 %v854_v6  ;;  %328 = vmatpush.bf16.msra.mxu2 %v852_v8 }
  0x2a   :  { %372 = vmatpush.bf16.msra.mxu3 %v852_v8 }
  0x2c   :  { %285 = vmatpush.bf16.msra.mxu1 %v851_v9  ;;  %769 = vmatmul.msk.bf16.gmra.mxu0 %vm150_vm0, %v845_v43 }
  0x2d   :  { %547 = vmatpush.bf16.msrb.mxu0 %v853_v7  ;;  %329 = vmatpush.bf16.msra.mxu2 %v851_v9 }
  0x2e   :  { %373 = vmatpush.bf16.msra.mxu3 %v851_v9 }
  0x30   :  { %286 = vmatpush.bf16.msra.mxu1 %v850_v10 }
  0x31   :  { %548 = vmatpush.bf16.msrb.mxu0 %v852_v8  ;;  %330 = vmatpush.bf16.msra.mxu2 %v850_v10 }
  0x32   :  { %374 = vmatpush.bf16.msra.mxu3 %v850_v10 }
  0x33   :  { %287 = vmatmul.bf16.vlgmr.msra.gmra.mxu1 %v1065_v11 }
  0x34   :  { %411 = vmatpush.bf16.msrb.mxu1 %v1129_v0 }
  0x35   :  { %455 = vmatpush.bf16.msrb.mxu2 %v1129_v0  ;;  %549 = vmatpush.bf16.msrb.mxu0 %v851_v9 }
  0x36   :  { %499 = vmatpush.bf16.msrb.mxu3 %v1129_v0 }
  0x38   :  { %412 = vmatpush.bf16.msrb.mxu1 %v1132_v2 }
  0x39   :  { %456 = vmatpush.bf16.msrb.mxu2 %v1132_v2  ;;  %550 = vmatpush.bf16.msrb.mxu0 %v850_v10 }
  0x3a   :  { %500 = vmatpush.bf16.msrb.mxu3 %v1132_v2 }
  0x3c   :  { %413 = vmatpush.bf16.msrb.mxu1 %v1137_v4 }
  0x3d   :  { %457 = vmatpush.bf16.msrb.mxu2 %v1137_v4 }
  0x3e   :  { %501 = vmatpush.bf16.msrb.mxu3 %v1137_v4 }
  0x40   :  { %414 = vmatpush.bf16.msrb.mxu1 %v854_v6 }
  0x41   :  { %458 = vmatpush.bf16.msrb.mxu2 %v854_v6 }
  0x42   :  { %502 = vmatpush.bf16.msrb.mxu3 %v854_v6 }
  0x44   :  { %415 = vmatpush.bf16.msrb.mxu1 %v853_v7 }
  0x45   :  { %459 = vmatpush.bf16.msrb.mxu2 %v853_v7 }
  0x46   :  { %503 = vmatpush.bf16.msrb.mxu3 %v853_v7 }
  0x48   :  { %416 = vmatpush.bf16.msrb.mxu1 %v852_v8 }
  0x49   :  { %460 = vmatpush.bf16.msrb.mxu2 %v852_v8 }
  0x4a   :  { %504 = vmatpush.bf16.msrb.mxu3 %v852_v8 }
  0x4c   :  { %417 = vmatpush.bf16.msrb.mxu1 %v851_v9 }
  0x4d   :  { %461 = vmatpush.bf16.msrb.mxu2 %v851_v9 }
  0x4e   :  { %505 = vmatpush.bf16.msrb.mxu3 %v851_v9 }
  0x50   :  { %418 = vmatpush.bf16.msrb.mxu1 %v850_v10 }
  0x51   :  { %462 = vmatpush.bf16.msrb.mxu2 %v850_v10 }
  0x52   :  { %506 = vmatpush.bf16.msrb.mxu3 %v850_v10 }
  0x54   :  { %587 = vmatpush.bf16.msra.mxu1 %v1129_v0 }
  0x58   :  { %588 = vmatpush.bf16.msra.mxu1 %v1132_v2 }
  0x5c   :  { %589 = vmatpush.bf16.msra.mxu1 %v1137_v4 }
  0x60   :  { %590 = vmatpush.bf16.msra.mxu1 %v854_v6 }
  0x64   :  { %591 = vmatpush.bf16.msra.mxu1 %v853_v7 }
  0x68   :  { %592 = vmatpush.bf16.msra.mxu1 %v852_v8 }
  0x6c   :  { %593 = vmatpush.bf16.msra.mxu1 %v851_v9 }
  0x70   :  { %594 = vmatpush.bf16.msra.mxu1 %v850_v10 }
  0x99   :  { %v172_v13 = vpop.f32.mrf.mxu0 }
  0x9a   :  { %v173_v14 = vadd.f32 %v1163_v12, %v172_v13 }
  0xa1   :  { %v174_v44 = vpop.f32.mrf.mxu0 }
  0xa2   :  { %v175_v45 = vadd.f32 %v1163_v12, %v174_v44 }
  0xa9   :  { %v177_v7 = vpop.f32.mrf.mxu0 }
  0xaa   :  { %v178_v8 = vadd.f32 %v1163_v12, %v177_v7 }
  0xb0   :  { %v288_v15 = vpop.f32.mrf.mxu1 }
  0xb1   :  { %v292_v16 = vadd.f32 %v288_v15, %v173_v14 }
  0xb3   :  { %v804_v17 = vmul.f32 -1.442695, %v292_v16  ;;  %v312_v28 = vadd.f32 %v1169_v23, %v292_v16 }
  0xb5   :  { %879 = vpow2.f32 %v804_v17 }
  0xb8   :  { %v290_v18 = vpop.f32.mrf.mxu1 }
  0xbb   :  { %v880_v19 = vpop.eup %879 }
  0xbc   :  { %v296_v20 = vadd.f32 1.0, %v880_v19 }
  0xbe   :  { %881 = vrcp.f32 %v296_v20  ;;  %v308_v25 = vand.u32 2147483648, %v296_v20  ;;  %v306_v27 = vand.u32 2147483647, %v296_v20  ;;  %vm302_vm2 = vweird.f32 %v296_v20 }
  0xbf   :  { %883 = vtanh.f32 %v312_v28 }
  0xc0   :  { %v309_v30 = vor.u32 1.1754944e-38, %v308_v25  ;;  %vm307_vm4 = vcmp.eq.f32.partialorder %v306_v27, 8.507059e+37 }
  0xc4   :  { %v882_v21 = vpop.eup %881 }
  0xc5   :  { %v298_v22 = vmul.f32 %v882_v21, %v296_v20  ;;  %vm303_vm1 = vweird.f32 %v882_v21  ;;  %v884_v38 = vpop.eup %883 }
  0xc6   :  { %vm304_vm3 = vmor %vm302_vm2, %vm303_vm1 }
  0xc7   :  { %v299_v24 = vsub.f32 1.0, %v298_v22 }
  0xc9   :  { %v300_v26 = vmul.f32 %v882_v21, %v299_v24 }
  0xcb   :  { %v301_v29 = vadd.f32 %v882_v21, %v300_v26 }
  0xcd   :  { %v305_v32 = vsel %vm304_vm3, %v882_v21, %v301_v29 }
  0xce   :  { %v310_v33 = vsel %vm307_vm4, %v309_v30, %v305_v32 }
  0xcf   :  { %v314_v35 = vsub.f32 1.0, %v310_v33  ;;  %v318_v40 = vmul.f32 0.0, %v310_v33 }
  0xd1   :  { %v315_v36 = vmul.f32 %v1175_v31, %v314_v35 }
  0xd3   :  { %v316_v37 = vadd.f32 %v1180_v34, %v315_v36 }
  0xd5   :  { %v317_v39 = vmul.f32 %v884_v38, %v316_v37  ;;  %v846_v38 = vld [vmem:[#allocation4 + $0x10] sm:$0xff] }
  0xd6   :  { %770 = vmatmul.msk.bf16.gmra.mxu0 %vm150_vm0, %v846_v38 }
  0xd7   :  { %v319_v41 = vadd.f32 %v318_v40, %v317_v39  ;;  %v179_v39 = vpop.f32.mrf.mxu0 }
  0xd8   :  { %v180_v40 = vadd.f32 %v1163_v12, %v179_v39 }
  0xd9   :  { %v322_v42 = vpack.c.bf16 %v319_v41, %v319_v41 }
  0xdb   :  { %331 = vmatmul.bf16.vlgmr.msra.gmra.mxu2 %v322_v42 }
 0x15e   :  { %v332_v46 = vpop.f32.mrf.mxu2 }
 0x15f   :  { %v336_v47 = vadd.f32 %v332_v46, %v175_v45 }
 0x161   :  { %v805_v48 = vmul.f32 -1.442695, %v336_v47  ;;  %v356_v58 = vadd.f32 %v1169_v23, %v336_v47 }
 0x163   :  { %885 = vpow2.f32 %v805_v48 }
 0x166   :  { %v334_v49 = vpop.f32.mrf.mxu2 }
 0x169   :  { %v886_v50 = vpop.eup %885 }
 0x16a   :  { %v340_v51 = vadd.f32 1.0, %v886_v50 }
 0x16c   :  { %887 = vrcp.f32 %v340_v51  ;;  %v352_v55 = vand.u32 2147483648, %v340_v51  ;;  %v350_v57 = vand.u32 2147483647, %v340_v51  ;;  %vm346_vm6 = vweird.f32 %v340_v51 }
 0x16d   :  { %889 = vtanh.f32 %v356_v58 }
 0x16e   :  { %v353_v60 = vor.u32 1.1754944e-38, %v352_v55  ;;  %vm351_vm8 = vcmp.eq.f32.partialorder %v350_v57, 8.507059e+37 }
 0x172   :  { %v888_v52 = vpop.eup %887 }
 0x173   :  { %v342_v53 = vmul.f32 %v888_v52, %v340_v51  ;;  %vm347_vm5 = vweird.f32 %v888_v52  ;;  %v890_v2 = vpop.eup %889 }
 0x174   :  { %vm348_vm7 = vmor %vm346_vm6, %vm347_vm5 }
 0x175   :  { %v343_v54 = vsub.f32 1.0, %v342_v53 }
 0x177   :  { %v344_v56 = vmul.f32 %v888_v52, %v343_v54 }
 0x179   :  { %v345_v59 = vadd.f32 %v888_v52, %v344_v56 }
 0x17b   :  { %v349_v61 = vsel %vm348_vm7, %v888_v52, %v345_v59 }
 0x17c   :  { %v354_v62 = vsel %vm351_vm8, %v353_v60, %v349_v61 }
 0x17d   :  { %v358_v63 = vsub.f32 1.0, %v354_v62  ;;  %v362_v4 = vmul.f32 %v354_v62, %v319_v41 }
 0x17f   :  { %v359_v0 = vmul.f32 %v1175_v31, %v358_v63 }
 0x181   :  { %v360_v1 = vadd.f32 %v1180_v34, %v359_v0 }
 0x183   :  { %v361_v3 = vmul.f32 %v890_v2, %v360_v1  ;;  %v182_v2 = vpop.f32.mrf.mxu0 }
 0x185   :  { %v363_v5 = vadd.f32 %v362_v4, %v361_v3  ;;  %v183_v3 = vadd.f32 %v1163_v12, %v182_v2 }
 0x187   :  { %v366_v6 = vpack.c.bf16 %v363_v5, %v363_v5 }
 0x189   :  { %375 = vmatmul.bf16.vlgmr.msra.gmra.mxu3 %v366_v6 }
 0x20c   :  { %v376_v9 = vpop.f32.mrf.mxu3 }
 0x20d   :  { %v380_v10 = vadd.f32 %v376_v9, %v178_v8 }
 0x20f   :  { %v806_v11 = vmul.f32 -1.442695, %v380_v10  ;;  %v400_v22 = vadd.f32 %v1169_v23, %v380_v10 }
 0x211   :  { %891 = vpow2.f32 %v806_v11 }
 0x214   :  { %v378_v13 = vpop.f32.mrf.mxu3 }
 0x217   :  { %v892_v14 = vpop.eup %891 }
 0x218   :  { %v384_v15 = vadd.f32 1.0, %v892_v14 }
 0x21a   :  { %893 = vrcp.f32 %v384_v15  ;;  %v396_v19 = vand.u32 2147483648, %v384_v15  ;;  %v394_v21 = vand.u32 2147483647, %v384_v15  ;;  %vm390_vm10 = vweird.f32 %v384_v15 }
 0x21b   :  { %895 = vtanh.f32 %v400_v22 }
 0x21c   :  { %v397_v25 = vor.u32 1.1754944e-38, %v396_v19  ;;  %vm395_vm12 = vcmp.eq.f32.partialorder %v394_v21, 8.507059e+37 }
 0x220   :  { %v894_v16 = vpop.eup %893 }
 0x221   :  { %v386_v17 = vmul.f32 %v894_v16, %v384_v15  ;;  %vm391_vm9 = vweird.f32 %v894_v16  ;;  %v896_v32 = vpop.eup %895 }
 0x222   :  { %vm392_vm11 = vmor %vm390_vm10, %vm391_vm9 }
 0x223   :  { %v387_v18 = vsub.f32 1.0, %v386_v17 }
 0x225   :  { %v388_v20 = vmul.f32 %v894_v16, %v387_v18 }
 0x227   :  { %v389_v24 = vadd.f32 %v894_v16, %v388_v20 }
 0x229   :  { %v393_v26 = vsel %vm392_vm11, %v894_v16, %v389_v24 }
 0x22a   :  { %v398_v27 = vsel %vm395_vm12, %v397_v25, %v393_v26 }
 0x22b   :  { %v402_v28 = vsub.f32 1.0, %v398_v27  ;;  %v406_v35 = vmul.f32 %v398_v27, %v363_v5 }
 0x22d   :  { %v403_v29 = vmul.f32 %v1175_v31, %v402_v28 }
 0x22f   :  { %v404_v30 = vadd.f32 %v1180_v34, %v403_v29 }
 0x231   :  { %v405_v33 = vmul.f32 %v896_v32, %v404_v30  ;;  %v847_v32 = vld [vmem:[#allocation4 + $0x18] sm:$0xff] }
 0x232   :  { %771 = vmatmul.msk.bf16.gmra.mxu0 %vm150_vm0, %v847_v32  ;;  %v861_v32 = vld [vmem:[#allocation10 + $0x18] sm:$0xff] }
 0x233   :  { %v407_v36 = vadd.f32 %v406_v35, %v405_v33  ;;  %v184_v33 = vpop.f32.mrf.mxu0 }
 0x234   :  { %v185_v35 = vadd.f32 %v1163_v12, %v184_v33  ;;  %v860_v33 = vld [vmem:[#allocation10 + $0x10] sm:$0xff] }
 0x235   :  { %v410_v37 = vpack.c.bf16 %v407_v36, %v407_v36 }
 0x237   :  { %419 = vmatmul.bf16.vlgmr.msrb.gmra.mxu1 %v410_v37 }
 0x2b4   :  { %v420_v41 = vpop.f32.mrf.mxu1 }
 0x2b5   :  { %v424_v42 = vadd.f32 %v420_v41, %v180_v40 }
 0x2b7   :  { %v807_v43 = vmul.f32 -1.442695, %v424_v42  ;;  %v444_v53 = vadd.f32 %v1169_v23, %v424_v42 }
 0x2b9   :  { %897 = vpow2.f32 %v807_v43 }
 0x2bc   :  { %v422_v44 = vpop.f32.mrf.mxu1 }
 0x2bf   :  { %v898_v45 = vpop.eup %897 }
 0x2c0   :  { %v428_v46 = vadd.f32 1.0, %v898_v45 }
 0x2c2   :  { %899 = vrcp.f32 %v428_v46  ;;  %v440_v50 = vand.u32 2147483648, %v428_v46  ;;  %v438_v52 = vand.u32 2147483647, %v428_v46  ;;  %vm434_vm14 = vweird.f32 %v428_v46 }
 0x2c3   :  { %901 = vtanh.f32 %v444_v53 }
 0x2c4   :  { %v441_v55 = vor.u32 1.1754944e-38, %v440_v50  ;;  %vm439_vm1 = vcmp.eq.f32.partialorder %v438_v52, 8.507059e+37 }
 0x2c8   :  { %v900_v47 = vpop.eup %899 }
 0x2c9   :  { %v430_v48 = vmul.f32 %v900_v47, %v428_v46  ;;  %vm435_vm13 = vweird.f32 %v900_v47  ;;  %v902_v61 = vpop.eup %901 }
 0x2ca   :  { %vm436_vm15 = vmor %vm434_vm14, %vm435_vm13 }
 0x2cb   :  { %v431_v49 = vsub.f32 1.0, %v430_v48 }
 0x2cd   :  { %v432_v51 = vmul.f32 %v900_v47, %v431_v49 }
 0x2cf   :  { %v433_v54 = vadd.f32 %v900_v47, %v432_v51 }
 0x2d1   :  { %v437_v56 = vsel %vm436_vm15, %v900_v47, %v433_v54 }
 0x2d2   :  { %v442_v57 = vsel %vm439_vm1, %v441_v55, %v437_v56 }
 0x2d3   :  { %v446_v58 = vsub.f32 1.0, %v442_v57  ;;  %v450_v63 = vmul.f32 %v442_v57, %v407_v36 }
 0x2d5   :  { %v447_v59 = vmul.f32 %v1175_v31, %v446_v58 }
 0x2d7   :  { %v448_v60 = vadd.f32 %v1180_v34, %v447_v59 }
 0x2d9   :  { %v449_v62 = vmul.f32 %v902_v61, %v448_v60  ;;  %v187_v61 = vpop.f32.mrf.mxu0 }
 0x2db   :  { %v451_v0 = vadd.f32 %v450_v63, %v449_v62  ;;  %v188_v63 = vadd.f32 %v1163_v12, %v187_v61 }
 0x2dd   :  { %v454_v1 = vpack.c.bf16 %v451_v0, %v451_v0 }
 0x2df   :  { %463 = vmatmul.bf16.vlgmr.msrb.gmra.mxu2 %v454_v1 }
 0x2e1   :  { %v189_v62 = vpop.f32.mrf.mxu0 }
 0x362   :  { %v464_v4 = vpop.f32.mrf.mxu2 }
 0x363   :  { %v468_v5 = vadd.f32 %v464_v4, %v183_v3 }
 0x365   :  { %v808_v6 = vmul.f32 -1.442695, %v468_v5  ;;  %v488_v17 = vadd.f32 %v1169_v23, %v468_v5 }
 0x367   :  { %903 = vpow2.f32 %v808_v6 }
 0x36a   :  { %v466_v7 = vpop.f32.mrf.mxu2 }
 0x36d   :  { %v904_v8 = vpop.eup %903 }
 0x36e   :  { %v472_v9 = vadd.f32 1.0, %v904_v8 }
 0x370   :  { %905 = vrcp.f32 %v472_v9  ;;  %v484_v14 = vand.u32 2147483648, %v472_v9  ;;  %v482_v16 = vand.u32 2147483647, %v472_v9  ;;  %vm478_vm3 = vweird.f32 %v472_v9 }
 0x371   :  { %907 = vtanh.f32 %v488_v17 }
 0x372   :  { %v485_v19 = vor.u32 1.1754944e-38, %v484_v14  ;;  %vm483_vm5 = vcmp.eq.f32.partialorder %v482_v16, 8.507059e+37 }
 0x376   :  { %v906_v10 = vpop.eup %905 }
 0x377   :  { %v474_v11 = vmul.f32 %v906_v10, %v472_v9  ;;  %vm479_vm2 = vweird.f32 %v906_v10  ;;  %v908_v26 = vpop.eup %907 }
 0x378   :  { %vm480_vm4 = vmor %vm478_vm3, %vm479_vm2 }
 0x379   :  { %v475_v13 = vsub.f32 1.0, %v474_v11 }
 0x37b   :  { %v476_v15 = vmul.f32 %v906_v10, %v475_v13 }
 0x37d   :  { %v477_v18 = vadd.f32 %v906_v10, %v476_v15 }
 0x37f   :  { %v481_v20 = vsel %vm480_vm4, %v906_v10, %v477_v18 }
 0x380   :  { %v486_v21 = vsel %vm483_vm5, %v485_v19, %v481_v20 }
 0x381   :  { %v490_v22 = vsub.f32 1.0, %v486_v21  ;;  %v494_v28 = vmul.f32 %v486_v21, %v451_v0 }
 0x383   :  { %v491_v24 = vmul.f32 %v1175_v31, %v490_v22 }
 0x385   :  { %v492_v25 = vadd.f32 %v1180_v34, %v491_v24 }
 0x387   :  { %v493_v27 = vmul.f32 %v908_v26, %v492_v25 }
 0x389   :  { %v495_v29 = vadd.f32 %v494_v28, %v493_v27  ;;  %v865_v27 = vld [vmem:[#allocation10 + $0x38] sm:$0xff]  ;;  %v864_v28 = vld [vmem:[#allocation10 + $0x30] sm:$0xff] }
 0x38a   :  { %701 = vmatpush.bf16.msra.mxu2 %v865_v27 }
 0x38b   :  { %v498_v30 = vpack.c.bf16 %v495_v29, %v495_v29 }
 0x38d   :  { %507 = vmatmul.bf16.vlgmr.msrb.gmra.mxu3 %v498_v30  ;;  %v862_v30 = vld [vmem:[#allocation10 + $0x20] sm:$0xff] }
 0x38e   :  { %702 = vmatpush.bf16.msra.mxu2 %v864_v28 }
 0x410   :  { %v508_v36 = vpop.f32.mrf.mxu3 }
 0x411   :  { %v512_v37 = vadd.f32 %v508_v36, %v185_v35  ;;  %v190_v35 = vadd.f32 %v1163_v12, %v189_v62 }
 0x413   :  { %v809_v38 = vmul.f32 -1.442695, %v512_v37  ;;  %v532_v48 = vadd.f32 %v1169_v23, %v512_v37 }
 0x415   :  { %909 = vpow2.f32 %v809_v38  ;;  %v859_v38 = vld [vmem:[#allocation10 + $0x8] sm:$0xff] }
 0x418   :  { %v510_v39 = vpop.f32.mrf.mxu3 }
 0x41b   :  { %v910_v40 = vpop.eup %909 }
 0x41c   :  { %v516_v41 = vadd.f32 1.0, %v910_v40  ;;  %v858_v40 = vld [vmem:[#allocation10] sm:$0xff] }
 0x41e   :  { %911 = vrcp.f32 %v516_v41  ;;  %v528_v45 = vand.u32 2147483648, %v516_v41  ;;  %v526_v47 = vand.u32 2147483647, %v516_v41  ;;  %vm522_vm0 = vweird.f32 %v516_v41 }
 0x41f   :  { %913 = vtanh.f32 %v532_v48 }
 0x420   :  { %v529_v50 = vor.u32 1.1754944e-38, %v528_v45  ;;  %vm527_vm8 = vcmp.eq.f32.partialorder %v526_v47, 8.507059e+37 }
 0x424   :  { %v912_v42 = vpop.eup %911 }
 0x425   :  { %v518_v43 = vmul.f32 %v912_v42, %v516_v41  ;;  %vm523_vm6 = vweird.f32 %v912_v42  ;;  %v914_v56 = vpop.eup %913 }
 0x426   :  { %vm524_vm7 = vmor %vm522_vm0, %vm523_vm6 }
 0x427   :  { %v519_v44 = vsub.f32 1.0, %v518_v43 }
 0x429   :  { %v520_v46 = vmul.f32 %v912_v42, %v519_v44 }
 0x42b   :  { %v521_v49 = vadd.f32 %v912_v42, %v520_v46 }
 0x42d   :  { %v525_v51 = vsel %vm524_vm7, %v912_v42, %v521_v49 }
 0x42e   :  { %v530_v52 = vsel %vm527_vm8, %v529_v50, %v525_v51 }
 0x42f   :  { %v534_v53 = vsub.f32 1.0, %v530_v52  ;;  %v538_v58 = vmul.f32 %v530_v52, %v495_v29  ;;  %v863_v29 = vld [vmem:[#allocation10 + $0x28] sm:$0xff] }
 0x430   :  { %703 = vmatpush.bf16.msra.mxu2 %v863_v29 }
 0x431   :  { %v535_v54 = vmul.f32 %v1175_v31, %v534_v53 }
 0x433   :  { %v536_v55 = vadd.f32 %v1180_v34, %v535_v54 }
 0x434   :  { %704 = vmatpush.bf16.msra.mxu2 %v862_v30 }
 0x435   :  { %v537_v57 = vmul.f32 %v914_v56, %v536_v55 }
 0x437   :  { %v539_v59 = vadd.f32 %v538_v58, %v537_v57 }
 0x438   :  { %705 = vmatpush.bf16.msra.mxu2 %v861_v32 }
 0x439   :  { %v542_v60 = vpack.c.bf16 %v539_v59, %v539_v59 }
 0x43b   :  { %551 = vmatmul.bf16.vlgmr.msrb.gmra.mxu0 %v542_v60 }
 0x43c   :  { %706 = vmatpush.bf16.msra.mxu2 %v860_v33 }
 0x440   :  { %707 = vmatpush.bf16.msra.mxu2 %v859_v38 }
 0x444   :  { %708 = vmatpush.bf16.msra.mxu2 %v858_v40 }
 0x4b8   :  { %v552_v0 = vpop.f32.mrf.mxu0 }
 0x4b9   :  { %v556_v1 = vadd.f32 %v552_v0, %v188_v63 }
 0x4bb   :  { %v810_v2 = vmul.f32 -1.442695, %v556_v1  ;;  %v576_v13 = vadd.f32 %v1169_v23, %v556_v1 }
 0x4bd   :  { %915 = vpow2.f32 %v810_v2 }
 0x4c0   :  { %v554_v3 = vpop.f32.mrf.mxu0 }
 0x4c3   :  { %v916_v4 = vpop.eup %915 }
 0x4c4   :  { %v560_v5 = vadd.f32 1.0, %v916_v4 }
 0x4c6   :  { %917 = vrcp.f32 %v560_v5  ;;  %v572_v9 = vand.u32 2147483648, %v560_v5  ;;  %v570_v11 = vand.u32 2147483647, %v560_v5  ;;  %vm566_vm10 = vweird.f32 %v560_v5 }
 0x4c7   :  { %919 = vtanh.f32 %v576_v13 }
 0x4c8   :  { %v573_v15 = vor.u32 1.1754944e-38, %v572_v9  ;;  %vm571_vm12 = vcmp.eq.f32.partialorder %v570_v11, 8.507059e+37 }
 0x4cc   :  { %v918_v6 = vpop.eup %917 }
 0x4cd   :  { %v562_v7 = vmul.f32 %v918_v6, %v560_v5  ;;  %vm567_vm9 = vweird.f32 %v918_v6  ;;  %v920_v21 = vpop.eup %919 }
 0x4ce   :  { %vm568_vm11 = vmor %vm566_vm10, %vm567_vm9 }
 0x4cf   :  { %v563_v8 = vsub.f32 1.0, %v562_v7 }
 0x4d1   :  { %v564_v10 = vmul.f32 %v918_v6, %v563_v8 }
 0x4d3   :  { %v565_v14 = vadd.f32 %v918_v6, %v564_v10 }
 0x4d5   :  { %v569_v16 = vsel %vm568_vm11, %v918_v6, %v565_v14 }
 0x4d6   :  { %v574_v17 = vsel %vm571_vm12, %v573_v15, %v569_v16 }
 0x4d7   :  { %v578_v18 = vsub.f32 1.0, %v574_v17  ;;  %v582_v24 = vmul.f32 %v574_v17, %v539_v59 }
 0x4d9   :  { %v579_v19 = vmul.f32 %v1175_v31, %v578_v18 }
 0x4db   :  { %v580_v20 = vadd.f32 %v1180_v34, %v579_v19 }
 0x4dd   :  { %v581_v22 = vmul.f32 %v920_v21, %v580_v20 }
 0x4df   :  { %v583_v25 = vadd.f32 %v582_v24, %v581_v22 }
 0x4e1   :  { %v586_v26 = vpack.c.bf16 %v583_v25, %v583_v25 }
 0x4e3   :  { %595 = vmatmul.bf16.vlgmr.msra.gmra.mxu1 %v586_v26 }
 0x560   :  { %v596_v36 = vpop.f32.mrf.mxu1 }
 0x561   :  { %v600_v37 = vadd.f32 %v596_v36, %v190_v35 }
 0x563   :  { %v811_v39 = vmul.f32 -1.442695, %v600_v37  ;;  %v620_v49 = vadd.f32 %v1169_v23, %v600_v37  ;;  %v878_v23 = vld [vmem:[%s1229_s8] ss:$0 sm:$0xff] }
 0x565   :  { %921 = vpow2.f32 %v811_v39 }
 0x568   :  { %v598_v41 = vpop.f32.mrf.mxu1 }
 0x56b   :  { %v922_v42 = vpop.eup %921 }
 0x56c   :  { %v604_v43 = vadd.f32 1.0, %v922_v42 }
 0x56e   :  { %923 = vrcp.f32 %v604_v43  ;;  %v616_v47 = vand.u32 2147483648, %v604_v43  ;;  %v614_v12 = vand.u32 2147483647, %v604_v43  ;;  %vm610_vm14 = vweird.f32 %v604_v43 }
 0x56f   :  { %925 = vtanh.f32 %v620_v49 }
 0x570   :  { %v617_v51 = vor.u32 1.1754944e-38, %v616_v47  ;;  %vm615_vm1 = vcmp.eq.f32.partialorder %v614_v12, 8.507059e+37 }
 0x574   :  { %v924_v44 = vpop.eup %923 }
 0x575   :  { %v606_v45 = vmul.f32 %v924_v44, %v604_v43  ;;  %vm611_vm13 = vweird.f32 %v924_v44  ;;  %v926_v57 = vpop.eup %925 }
 0x576   :  { %vm612_vm15 = vmor %vm610_vm14, %vm611_vm13 }
 0x577   :  { %v607_v46 = vsub.f32 1.0, %v606_v45 }
 0x579   :  { %v608_v48 = vmul.f32 %v924_v44, %v607_v46 }
 0x57b   :  { %v609_v50 = vadd.f32 %v924_v44, %v608_v48 }
 0x57d   :  { %v613_v52 = vsel %vm612_vm15, %v924_v44, %v609_v50 }
 0x57e   :  { %v618_v53 = vsel %vm615_vm1, %v617_v51, %v613_v52 }
 0x57f   :  { %v622_v54 = vsub.f32 1.0, %v618_v53  ;;  %v626_v59 = vmul.f32 %v618_v53, %v583_v25 }
 0x581   :  { %v623_v55 = vmul.f32 %v1175_v31, %v622_v54 }
 0x583   :  { %v624_v56 = vadd.f32 %v1180_v34, %v623_v55 }
 0x585   :  { %v625_v58 = vmul.f32 %v926_v57, %v624_v56 }
 0x587   :  { %v627_v60 = vadd.f32 %v626_v59, %v625_v58 }
 0x589   :  { %v632_v61 = vpack.c.bf16 %v627_v60, %v627_v60 }
 0x58b   :  { %709 = vmatmul.bf16.vlgmr.msra.gmra.mxu2 %v632_v61 }
 0x60e   :  { %v710_v62 = vpop.f32.mrf.mxu2 }
 0x60f   :  { %v711_v63 = vadd.f32 %v878_v23, %v710_v62 }
 0x611   :  { %714 = vmax.xlane.f32.xlu0 %v711_v63 }
 0x616   :  { %v712_v0 = vpop.f32.mrf.mxu2 }
 0x684   :  { %v715_v1 = vpop.xlane.xlu0 %714 }
 0x685   :  { %v716_v2 = vsub.f32 %v711_v63, %v715_v1 }
 0x687   :  { %v717_v3 = vmul.f32 1.442695, %v716_v2 }
 0x689   :  { %927 = vpow2.f32 %v717_v3 }
 0x68f   :  { %v928_v31 = vpop.eup %927 }
 0x690   :  { %719 = vadd.xlane.f32.xlu0 %v928_v31 }
 0x703   :  { %v720_v34 = vpop.xlane.xlu0 %719 }
 0x704   :  { %929 = vlog2.f32 %v720_v34 }
 0x70a   :  { %v930_v4 = vpop.eup %929 }
 0x70b   :  { %v722_v5 = vmul.f32 0.6931472, %v930_v4 }
 0x70d   :  { %v723_v6 = vsub.f32 %v716_v2, %v722_v5 }
 0x70f   :  { %724 = vst [vmem:[#allocation12] sm:$0xff] %v723_v6 }
 0x710   :  { %735 = dma.vmem_to_hbm [thread:$0]  %s731_s13, 128, %s733_s16, [#allocation6]  }
 0x711   :  { %1057 = dma.done.wait [#allocation6], 128  }
 0x712   :  { %1058 = vsyncadd [#allocation6], 4294967168 }
 0x713   :  { %740 = vsyncpa [#allocation5], 1 }
 0x714   :  { %741 = vsyncpa [#allocation8], 1 }
 0x715   :  { %742 = vsyncpa [#allocation11], 1 }
 0x716   :  { %743 = vsyncpa [#allocation6], 1 }

</bundles_post_ra>
